<compile_context>
chip_gen: v5e
topology: v5e:2x2
jax: 0.10.0
libtpu: 0.0.40
codegen_flags: <defaults>
</compile_context>

<pallas_src>
import jax
import jax.numpy as jnp
from jax.experimental import pallas as pl
from jax.experimental.pallas import tpu as pltpu

HORSES_PER_RACE = 14


def _make_kernel(d_src):
    """Kernel over flattened 2D row tiles.  d_src is a static Python int."""

    def kernel(src_ref, seq_ref, out_ref):
        # src_ref: (R, D_src)   seq_ref: (R, F_seq)   out_ref: (R, D_out)
        src = src_ref[...]
        seq = seq_ref[...]
        rows = seq.shape[0]

        # Horse-id channel (float valued; 0 means "no horse").  Truncating
        # cast matches torch `.type(torch.long)` exactly.
        idx_i = seq[:, 0].astype(jnp.int32) - 1            # (R,), -1 when empty

        # One-hot over the 14 horse slots; idx == 0 -> idx_i == -1 matches no
        # iota position, reproducing the PyTorch masked-scatter (row stays 0).
        iota = jax.lax.broadcasted_iota(jnp.int32, (rows, HORSES_PER_RACE), 1)
        onehot = (idx_i[:, None] == iota).astype(out_ref.dtype)   # (R, 14)

        # Direct slice stores instead of a lane-axis concatenate.
        out_ref[:, :d_src] = src.astype(out_ref.dtype)
        out_ref[:, d_src:d_src + HORSES_PER_RACE] = onehot
        out_ref[:, d_src + HORSES_PER_RACE:] = seq[:, 1:].astype(out_ref.dtype)

    return kernel


def feature_embedding(src, seq, *, row_tile=1024):
    """src: (B, S, D_src) float32; seq: (B, S, F_seq) float32 with seq[...,0]
    holding integer horse ids in {0, 1, ..., 14} stored as floats.

    Returns (B, S, D_src + 14 + F_seq - 1) with src's dtype.
    """
    B, S, D_src = src.shape
    _, _, F_seq = seq.shape
    D_out = D_src + HORSES_PER_RACE + (F_seq - 1)

    # Flatten batch/seq so the kernel works on lane-dense 2D row tiles.
    N = B * S
    src2 = src.reshape(N, D_src)
    seq2 = seq.reshape(N, F_seq)

    if N <= row_tile:
        # Small problem: single block covering everything — no pipeline
        # prologue/epilogue, no per-step overhead.
        R = N
    else:
        # Large row tile (multiple of 8); partial last block is masked by
        # Pallas.  ~R * (D_src + F_seq + D_out) * 4 bytes per step — tiny vs
        # VMEM on every generation, so no vmem_limit_bytes needed.
        R = row_tile

    grid = (pl.cdiv(N, R),)

    out2 = pl.pallas_call(
        _make_kernel(D_src),
        out_shape=jax.ShapeDtypeStruct((N, D_out), src.dtype),
        grid_spec=pltpu.PrefetchScalarGridSpec(
            num_scalar_prefetch=0,
            grid=grid,
            in_specs=[
                pl.BlockSpec((R, D_src), lambda i: (i, 0)),
                pl.BlockSpec((R, F_seq), lambda i: (i, 0)),
            ],
            out_specs=pl.BlockSpec((R, D_out), lambda i: (i, 0)),
        ),
        compiler_params=pltpu.CompilerParams(
            dimension_semantics=("parallel",)),
    )(src2, seq2)

    return out2.reshape(B, S, D_out)


def _reference(src, seq):
    # Pure-JAX reference mirroring the PyTorch forward.
    idx = seq[..., 0].astype(jnp.int32)
    onehot = jax.nn.one_hot(idx - 1, HORSES_PER_RACE, dtype=seq.dtype)
    onehot = jnp.where((idx != 0)[..., None], onehot, 0.0)
    emb = jnp.concatenate([onehot, seq[..., 1:]], axis=-1)
    return jnp.concatenate([src, emb], axis=-1)


if __name__ == "__main__":
    key = jax.random.PRNGKey(0)
    k_src, k_idx, k_rest = jax.random.split(key, 3)

    B, S = 2, 8
    D_SRC = 32      # continuous race/horse features
    F_SEQ = 5       # [horse_id, 4 other sequence features]

    src = jax.random.normal(k_src, (B, S, D_SRC), dtype=jnp.float32)
    # horse ids in {0, ..., 14} stored as floats (0 means "no horse")
    horse_id = jax.random.randint(k_idx, (B, S, 1), 0, HORSES_PER_RACE + 1)
    horse_id = horse_id.astype(jnp.float32)
    rest = jax.random.normal(k_rest, (B, S, F_SEQ - 1), dtype=jnp.float32)
    seq = jnp.concatenate([horse_id, rest], axis=-1)

    out = feature_embedding(src, seq)
    jax.block_until_ready(out)

    ref = _reference(src, seq)
    assert out.shape == (B, S, D_SRC + HORSES_PER_RACE + F_SEQ - 1)
    assert jnp.allclose(out, ref, atol=1e-6), "mismatch vs reference"

    print("KERNEL_OK")
</pallas_src>

<mosaic_0001>
module attributes {stable_mosaic.version = 11 : i64} {
  func.func @kernel(%arg0: i32, %arg1: memref<16x32xf32, #tpu.memory_space<vmem>>, %arg2: memref<16x5xf32, #tpu.memory_space<vmem>>, %arg3: memref<16x50xf32, #tpu.memory_space<vmem>>) attributes {dimension_semantics = [#tpu.dimension_semantics<parallel>], iteration_bounds = array<i64: 1>, scalar_prefetch = 0 : i64, scratch_operands = 0 : i64, tpu.core_type = #tpu.core_type<tc>, window_params = [{transform_indices = @transform_0, window_bounds = array<i64: 16, 32>}, {transform_indices = @transform_1, window_bounds = array<i64: 16, 5>}, {transform_indices = @transform_2, window_bounds = array<i64: 16, 50>}]} {
    %c0 = arith.constant 0 : index
    %c0_0 = arith.constant 0 : index
    %0 = vector.load %arg1[%c0, %c0_0] : memref<16x32xf32, #tpu.memory_space<vmem>>, vector<16x32xf32>
    %c0_1 = arith.constant 0 : index
    %c0_2 = arith.constant 0 : index
    %1 = vector.load %arg2[%c0_1, %c0_2] : memref<16x5xf32, #tpu.memory_space<vmem>>, vector<16x5xf32>
    %2 = vector.extract_strided_slice %1 {offsets = [0, 0], sizes = [16, 1], strides = [1, 1]} : vector<16x5xf32> to vector<16x1xf32>
    %3 = vector.shape_cast %2 : vector<16x1xf32> to vector<16xf32>
    %4 = arith.fptosi %3 : vector<16xf32> to vector<16xi32>
    %c1_i32 = arith.constant 1 : i32
    %5 = vector.broadcast %c1_i32 : i32 to vector<16xi32>
    %6 = arith.subi %4, %5 : vector<16xi32>
    %7 = tpu.iota {dimensions = array<i32: 1>} : vector<16x14xi32>
    %8 = vector.shape_cast %6 : vector<16xi32> to vector<16x1xi32>
    %9 = vector.broadcast %8 : vector<16x1xi32> to vector<16x14xi32>
    %10 = arith.cmpi eq, %9, %7 : vector<16x14xi32>
    %11 = arith.extui %10 : vector<16x14xi1> to vector<16x14xi32>
    %12 = arith.sitofp %11 : vector<16x14xi32> to vector<16x14xf32>
    %c0_3 = arith.constant 0 : index
    %c0_4 = arith.constant 0 : index
    %13 = vector.load %arg3[%c0_3, %c0_4] : memref<16x50xf32, #tpu.memory_space<vmem>>, vector<16x32xf32>
    tpu.vector_store %arg3[%c0_3, %c0_4], %0 {strides = array<i32>} : memref<16x50xf32, #tpu.memory_space<vmem>>, vector<16x32xf32>,
    %c0_5 = arith.constant 0 : index
    %c32 = arith.constant 32 : index
    %14 = vector.load %arg3[%c0_5, %c32] : memref<16x50xf32, #tpu.memory_space<vmem>>, vector<16x14xf32>
    tpu.vector_store %arg3[%c0_5, %c32], %12 {strides = array<i32>} : memref<16x50xf32, #tpu.memory_space<vmem>>, vector<16x14xf32>,
    %15 = vector.extract_strided_slice %1 {offsets = [0, 1], sizes = [16, 4], strides = [1, 1]} : vector<16x5xf32> to vector<16x4xf32>
    %c0_6 = arith.constant 0 : index
    %c46 = arith.constant 46 : index
    %16 = vector.load %arg3[%c0_6, %c46] : memref<16x50xf32, #tpu.memory_space<vmem>>, vector<16x4xf32>
    tpu.vector_store %arg3[%c0_6, %c46], %15 {strides = array<i32>} : memref<16x50xf32, #tpu.memory_space<vmem>>, vector<16x4xf32>,
    return
  }
  func.func @transform_0(%arg0: i32) -> (i32, i32) {
    %c0_i32 = arith.constant 0 : i32
    %c0_i32_0 = arith.constant 0 : i32
    return %arg0, %c0_i32 : i32, i32
  }
  func.func @transform_1(%arg0: i32) -> (i32, i32) {
    %c0_i32 = arith.constant 0 : i32
    %c0_i32_0 = arith.constant 0 : i32
    return %arg0, %c0_i32 : i32, i32
  }
  func.func @transform_2(%arg0: i32) -> (i32, i32) {
    %c0_i32 = arith.constant 0 : i32
    %c0_i32_0 = arith.constant 0 : i32
    return %arg0, %c0_i32 : i32, i32
  }
}

</mosaic_0001>

<bundles_post_ra>
// kernel: tpu_custom_call.1
= control target key start
LH: loop header
LB: loop body
LE: loop exit
PB: predicated region body
PF: predicated region fallthrough
CT: control target
= control target key end

     0   :  { %s167_s0 = inlined_call_operand.vmem [shape: f32[16,32], index: 0, kind: input, shape index: {}]   ;;  %s168_s1 = inlined_call_operand.vmem [shape: f32[16,5], index: 1, kind: input, shape index: {}]   ;;  %s169_s2 = inlined_call_operand.hbm [shape: f32[16,50], index: 2, kind: output, shape index: {}]  }
   0x1   :  { %v14_v0 = vld [vmem:[%s168_s1] sm:$0xff]  ;;  %v15_v1 = vld [vmem:[%s168_s1 + $0x8] sm:$0xff] }
   0x2   :  { %7 = vsyncpa [#allocation3], 0  ;;  %v130_v2 = vmov 0   ;;  %vm81_vm0 = vcmp.lt.s32.totalorder %v14_v0, 0  ;;  %v82_v3 = vceil.f32 %v14_v0  ;;  %v83_v4 = vfloor.f32 %v14_v0  ;;  %s131_s13 = smov 45   ;;  %s133_s1 = smov 32  }
   0x3   :  { %98 = vset.pattern.permute.xlu0 %v130_v2  ;;  %vm86_vm1 = vcmp.lt.s32.totalorder %v15_v1, 0  ;;  %v87_v5 = vceil.f32 %v15_v1  ;;  %v88_v6 = vfloor.f32 %v15_v1  ;;  %52 = vrot.lane.b32.xlu2 %v15_v1, %s131_s13  ;;  %v20_v13 = vlaneseq  ;;  %v13_v21 = vld [vmem:[%s167_s0 + $0x8] sm:$0xff]  ;;  %v12_v22 = vld [vmem:[%s167_s0] sm:$0xff]  ;;  %s134_s18 = smov [#allocation2]   ;;  %s65_s22 = sshll.u32 %s169_s2, 4  ;;  %s66_s22 = int_to_ptr.hbm [resolvable:$true] %s65_s22 }
   0x4   :  { %v84_v7 = vsel %vm81_vm0, %v82_v3, %v83_v4  ;;  %v132_v17 = vmov 0.0   ;;  %vm34_vm4 = vcmask 261120   ;;  %vm45_vm5 = vcmask 376064   ;;  %s63_s19 = sshll.u32 %s134_s18, 4  ;;  %s135_s0 = smov 128   ;;  %s64_s19 = int_to_ptr.vmem [resolvable:$true] %s63_s19 }
   0x5   :  { %v85_v8 = vcvt.f32.s32 %v84_v7  ;;  %v89_v9 = vsel %vm86_vm1, %v87_v5, %v88_v6  ;;  %v21_v15 = vand.u32 127, %v20_v13  ;;  %36 = vst.msk [vmem:[#allocation2 + $0x8] sm:$0xff] %vm34_vm4, %v13_v21  ;;  %vm56_vm6 = vcmask 408944   ;;  %s136_s23 = smov 8  }
   0x6   :  { %v90_v11 = vcvt.f32.s32 %v89_v9  ;;  %35 = vst.msk [vmem:[#allocation2] sm:$0xff] %vm34_vm4, %v12_v22 }
   0x7   :  { %v77_v10 = vadd.s32 4294967295, %v85_v8 }
   0x8   :  { %v78_v12 = vadd.s32 4294967295, %v90_v11 }
   0x9   :  { %23 = vperm.xlu0 %98, %v77_v10  }
  0x11   :  { %26 = vperm.xlu0 %98, %v78_v12  }
  0x5d   :  { %v53_v26 = vpop.permute.xlu2 %52 }
  0x7b   :  { %v24_v14 = vpop.permute.xlu0 %23 }
  0x7c   :  { %vm28_vm2 = vcmp.eq.s32.totalorder %v24_v14, %v21_v15 }
  0x7d   :  { %v79_v18 = vsel %vm28_vm2, 1.0, %v132_v17 }
  0x83   :  { %v27_v16 = vpop.permute.xlu0 %26 }
  0x84   :  { %vm29_vm3 = vcmp.eq.s32.totalorder %v27_v16, %v21_v15 }
  0x85   :  { %v80_v19 = vsel %vm29_vm3, 1.0, %v132_v17 }
  0x86   :  { %v99_v20 = vpack.i.bf16 %v80_v19, %v79_v18 }
  0x88   :  { %100 = vrot.lane.b32.xlu1 %v99_v20, %s133_s1 }
  0x90   :  { %50 = vrot.lane.b32.xlu1 %v14_v0, %s131_s13 }
  0xfa   :  { %v101_v23 = vpop.permute.xlu1 %100 }
  0xfb   :  { %v103_v24 = vunpack.i.h.bf16 %v101_v23  ;;  %v102_v25 = vunpack.i.l.bf16 %v101_v23 }
  0xfd   :  { %47 = vst.msk [vmem:[#allocation2 + $0x8] sm:$0xff] %vm45_vm5, %v103_v24 }
  0xfe   :  { %58 = vst.msk [vmem:[#allocation2 + $0x8] sm:$0xff] %vm56_vm6, %v53_v26 }
  0xff   :  { %46 = vst.msk [vmem:[#allocation2] sm:$0xff] %vm45_vm5, %v102_v25 }
 0x102   :  { %v51_v27 = vpop.permute.xlu1 %50 }
 0x103   :  { %57 = vst.msk [vmem:[#allocation2] sm:$0xff] %vm56_vm6, %v51_v27 }
 0x104   :  { %71 = dma.vmem_to_hbm [thread:$0]  %s64_s19, 256, %s66_s22, [#allocation3], %s135_s0, %s135_s0, %s136_s23  }
 0x105   :  { %128 = dma.done.wait [#allocation3], 256  }
 0x106   :  { %129 = vsyncadd [#allocation3], 4294967040 }
 0x107   :  { %76 = vsyncpa [#allocation3], 1 }

</bundles_post_ra>
